<compile_context>
chip_gen: v7x
topology: tpu7x:2x2x1
jax: 0.10.0
libtpu: 0.0.40
codegen_flags: <defaults>
</compile_context>

<pallas_src>
import numpy as np
import jax
import jax.numpy as jnp
from jax.experimental import pallas as pl
from jax.experimental.pallas import tpu as pltpu


# ----------------------------- TT glue (plain JAX, host-side) -----------------

def make_tt_cores(key, in_dims, out_dims, tt_rank, scale=0.1):
    """Deterministically initialize TT cores for a TT-matrix layer."""
    d = len(in_dims)
    ranks = [1] + [tt_rank] * (d - 1) + [1]
    cores = []
    for k in range(d):
        key, sub = jax.random.split(key)
        shape = (ranks[k], in_dims[k], out_dims[k], ranks[k + 1])
        cores.append(scale * jax.random.normal(sub, shape, dtype=jnp.float32))
    return cores, key


def tt_to_full(cores, in_dims, out_dims):
    """Contract TT cores into a dense (prod(in_dims), prod(out_dims)) matrix."""
    d = len(in_dims)
    res = cores[0]  # (1, n1, m1, r1)
    for k in range(1, d):
        c = cores[k]
        rk = c.shape[0]
        res = res.reshape(-1, rk) @ c.reshape(rk, -1)
    # interleaved shape (n1, m1, n2, m2, ..., nd, md)
    res = res.reshape(tuple(s for p in zip(in_dims, out_dims) for s in p))
    perm = list(range(0, 2 * d, 2)) + list(range(1, 2 * d, 2))
    res = jnp.transpose(res, perm)
    return res.reshape(int(np.prod(in_dims)), int(np.prod(out_dims)))


# ----------------------------- Pallas kernel ----------------------------------

def ae_kernel(x_ref, w_ref, b_ref, o_ref):
    x = x_ref[...]
    if x.dtype != jnp.bfloat16:          # static (trace-time) dtype check
        x = x.astype(jnp.bfloat16)
    # Fused encoder∘decoder GEMM: bf16 MXU operands, f32 accumulation.
    y = jnp.dot(x, w_ref[...], preferred_element_type=jnp.float32)
    # Bias is a (1, D) VMEM-resident block broadcast over the batch tile (f32 VPU).
    y = y + b_ref[...]
    # sigmoid(y) = 1 / (1 + exp(-y)): exp and reciprocal both run on the EUP slot.
    o_ref[...] = pl.reciprocal(1.0 + jnp.exp(-y), approx=True).astype(o_ref.dtype)


def _num_tensorcores():
    """2 TensorCores per chip on v7x, 1 on v5e/v6e. Fallback: 1."""
    try:
        kind = jax.devices()[0].device_kind.lower()
    except Exception:
        return 1
    return 2 if "v7" in kind else 1


def _choose_tb(B, D, x_itemsize, out_itemsize):
    """Generation-aware batch tile: one tile per TensorCore, VMEM-capped."""
    n_tc = _num_tensorcores()
    tb = pl.cdiv(B, n_tc)
    # Keep double-buffered x + out tiles under a conservative scoped-VMEM budget
    # (12 MiB fits v5e's 16 MiB default scoped limit; trivially fine on v6e/v7x).
    vmem_budget = 12 * 1024 * 1024
    per_row = 2 * D * (x_itemsize + out_itemsize)   # 2 pipeline buffers each
    cap = max(8, (vmem_budget // per_row) // 8 * 8)
    tb = min(tb, cap, B)
    if tb != B:
        tb = pl.cdiv(tb, 8) * 8                     # (8,128) sublane alignment
    return tb


def tt_autoencoder_forward(x, w_fused_bf16, b_fused, *, tb=None):
    """x: (B, D) bf16/f32, w_fused_bf16: (D, D) bf16, b_fused: (1, D) f32 -> (B, D) f32."""
    B, D = x.shape
    assert w_fused_bf16.shape == (D, D)
    out_dtype = jnp.float32
    if tb is None:
        tb = _choose_tb(B, D, x.dtype.itemsize, jnp.dtype(out_dtype).itemsize)
    tb = min(tb, B)
    grid = (pl.cdiv(B, tb),)

    cost = pl.CostEstimate(
        flops=2 * B * D * D,
        transcendentals=B * D,
        bytes_accessed=(B * D * x.dtype.itemsize            # x
                        + D * D * 2                          # fused weight (bf16)
                        + D * 4                              # fused bias (f32)
                        + B * D * 4),                        # output (f32)
    )

    return pl.pallas_call(
        ae_kernel,
        out_shape=jax.ShapeDtypeStruct((B, D), out_dtype),
        grid=grid,
        in_specs=[
            pl.BlockSpec((tb, D), lambda i: (i, 0)),      # x: batch-tiled, pipelined
            pl.BlockSpec((D, D), lambda i: (0, 0)),       # fused weight: VMEM-resident
            pl.BlockSpec((1, D), lambda i: (0, 0)),       # fused bias: VMEM-resident
        ],
        out_specs=pl.BlockSpec((tb, D), lambda i: (i, 0)),
        compiler_params=pltpu.CompilerParams(
            dimension_semantics=("parallel",)),           # megacore split on v7x
        cost_estimate=cost,
    )(x, w_fused_bf16, b_fused)


# ----------------------------- driver ------------------------------------------

if __name__ == "__main__":
    # Module config: input_tensor=[4, 8, 4] (D_in=128), hidden_tensors=[[4, 4, 4]]
    # (D_hid=64), tt_rank=2.
    input_tensor = [4, 8, 4]
    hidden_tensor = [4, 4, 4]
    tt_rank = 2
    B = 256
    D_in = int(np.prod(input_tensor))    # 128
    D_hid = int(np.prod(hidden_tensor))  # 64

    key = jax.random.PRNGKey(0)

    # encoder1 = TTLinear(input_tensor -> hidden_tensor)
    enc_cores, key = make_tt_cores(key, input_tensor, hidden_tensor, tt_rank)
    # decoder1 = TTLinear(hidden_tensor -> input_tensor)
    dec_cores, key = make_tt_cores(key, hidden_tensor, input_tensor, tt_rank)

    w_enc = tt_to_full(enc_cores, input_tensor, hidden_tensor)   # (128, 64) f32
    w_dec = tt_to_full(dec_cores, hidden_tensor, input_tensor)   # (64, 128) f32

    key, kb1, kb2, kx = jax.random.split(key, 4)
    b_enc = 0.01 * jax.random.normal(kb1, (1, D_hid), dtype=jnp.float32)
    b_dec = 0.01 * jax.random.normal(kb2, (1, D_in), dtype=jnp.float32)

    # Host-side algebraic fusion (no inter-layer activation in the module).
    w_fused = (w_enc @ w_dec).astype(jnp.bfloat16)               # (128, 128) bf16
    b_fused = (b_enc @ w_dec + b_dec).astype(jnp.float32)        # (1, 128) f32

    # Producer emits bf16 natively -> halves input HBM/DMA bytes into the kernel.
    x = jax.random.normal(kx, (B, D_in), dtype=jnp.float32).astype(jnp.bfloat16)

    out = tt_autoencoder_forward(x, w_fused, b_fused)
    out = jax.block_until_ready(out)

    # Reference check against the ORIGINAL (unfused, f32-math) module semantics on
    # the same bf16 input values.
    xf = x.astype(jnp.float32)
    ref = jax.nn.sigmoid((xf @ w_enc + b_enc) @ w_dec + b_dec)
    np.testing.assert_allclose(np.asarray(out), np.asarray(ref),
                               rtol=2e-2, atol=5e-3)

    print("KERNEL_OK")
</pallas_src>

<mosaic_0001>
module attributes {stable_mosaic.version = 11 : i64} {
  func.func @ae_kernel(%arg0: i32, %arg1: memref<256x128xbf16, #tpu.memory_space<vmem>>, %arg2: memref<128x128xbf16, #tpu.memory_space<vmem>>, %arg3: memref<1x128xf32, #tpu.memory_space<vmem>>, %arg4: memref<256x128xf32, #tpu.memory_space<vmem>>) attributes {dimension_semantics = [#tpu.dimension_semantics<parallel>], iteration_bounds = array<i64: 1>, scalar_prefetch = 0 : i64, scratch_operands = 0 : i64, tpu.core_type = #tpu.core_type<tc>, window_params = [{transform_indices = @transform_0, window_bounds = array<i64: 256, 128>}, {pipeline_mode = #tpu.pipeline_mode<synchronous>, transform_indices = @transform_1, window_bounds = array<i64: 128, 128>}, {pipeline_mode = #tpu.pipeline_mode<synchronous>, transform_indices = @transform_2, window_bounds = array<i64: 1, 128>}, {transform_indices = @transform_3, window_bounds = array<i64: 256, 128>}]} {
    %c0 = arith.constant 0 : index
    %c0_0 = arith.constant 0 : index
    %0 = vector.load %arg1[%c0, %c0_0] : memref<256x128xbf16, #tpu.memory_space<vmem>>, vector<256x128xbf16>
    %c0_1 = arith.constant 0 : index
    %c0_2 = arith.constant 0 : index
    %1 = vector.load %arg2[%c0_1, %c0_2] : memref<128x128xbf16, #tpu.memory_space<vmem>>, vector<128x128xbf16>
    %cst = arith.constant dense<0.000000e+00> : vector<256x128xf32>
    %2 = tpu.matmul %0, %1, %cst {dimension_numbers = #tpu.dot_dimension_numbers<[1], [0], [0], [1], [0, 0, 1, 1], [], []>} : vector<256x128xbf16>, vector<128x128xbf16>, vector<256x128xf32> -> vector<256x128xf32>
    %c0_3 = arith.constant 0 : index
    %c0_4 = arith.constant 0 : index
    %3 = vector.load %arg3[%c0_3, %c0_4] : memref<1x128xf32, #tpu.memory_space<vmem>>, vector<1x128xf32>
    %4 = vector.broadcast %3 : vector<1x128xf32> to vector<256x128xf32>
    %5 = arith.addf %2, %4 : vector<256x128xf32>
    %cst_5 = arith.constant 0.000000e+00 : f32
    %6 = vector.broadcast %cst_5 : f32 to vector<256x128xf32>
    %7 = arith.subf %6, %5 : vector<256x128xf32>
    %8 = math.exp %7 : vector<256x128xf32>
    %cst_6 = arith.constant 1.000000e+00 : f32
    %9 = vector.broadcast %cst_6 : f32 to vector<256x128xf32>
    %10 = arith.addf %9, %8 : vector<256x128xf32>
    %11 = tpu.reciprocal %10 {approx = true} : vector<256x128xf32> -> vector<256x128xf32>
    %c0_7 = arith.constant 0 : index
    %c0_8 = arith.constant 0 : index
    %12 = vector.load %arg4[%c0_7, %c0_8] : memref<256x128xf32, #tpu.memory_space<vmem>>, vector<256x128xf32>
    tpu.vector_store %arg4[%c0_7, %c0_8], %11 {strides = array<i32>} : memref<256x128xf32, #tpu.memory_space<vmem>>, vector<256x128xf32>,
    return
  }
  func.func @transform_0(%arg0: i32) -> (i32, i32) {
    %c0_i32 = arith.constant 0 : i32
    %c0_i32_0 = arith.constant 0 : i32
    return %arg0, %c0_i32 : i32, i32
  }
  func.func @transform_1(%arg0: i32) -> (i32, i32) {
    %c0_i32 = arith.constant 0 : i32
    %c0_i32_0 = arith.constant 0 : i32
    %c0_i32_1 = arith.constant 0 : i32
    return %c0_i32, %c0_i32_0 : i32, i32
  }
  func.func @transform_2(%arg0: i32) -> (i32, i32) {
    %c0_i32 = arith.constant 0 : i32
    %c0_i32_0 = arith.constant 0 : i32
    %c0_i32_1 = arith.constant 0 : i32
    return %c0_i32, %c0_i32_0 : i32, i32
  }
  func.func @transform_3(%arg0: i32) -> (i32, i32) {
    %c0_i32 = arith.constant 0 : i32
    %c0_i32_0 = arith.constant 0 : i32
    return %arg0, %c0_i32 : i32, i32
  }
}

</mosaic_0001>

<bundles_post_ra>
// kernel: tpu_custom_call.1
= control target key start
LH: loop header
LB: loop body
LE: loop exit
PB: predicated region body
PF: predicated region fallthrough
CT: control target
= control target key end

     0   :  { %8 = vsyncpa [#allocation3], 0  ;;  %s1076_s0 = inlined_call_operand.hbm [shape: bf16[256,128], index: 0, kind: input, shape index: {}]   ;;  %s1077_s1 = inlined_call_operand.hbm [shape: bf16[128,128], index: 1, kind: input, shape index: {}]   ;;  %s1078_s2 = inlined_call_operand.vmem [shape: f32[1,128], index: 2, kind: input, shape index: {}]   ;;  %s1079_s3 = inlined_call_operand.hbm [shape: f32[256,128], index: 3, kind: output, shape index: {}]  }
   0x1   :  { %9 = vsyncpa [#allocation6], 0 }
   0x2   :  { %10 = vsyncpa [#allocation4], 0  ;;  %s958_s12 = smov [#allocation2]   ;;  %s886_s16 = scalar_lea.hbm %s1076_s0, 2048 }
   0x3   :  { %s16_s13 = sshll.u32 %s958_s12, 4  ;;  %p887_p0 = scmp.ne.s32.totalorder %s1076_s0, %s886_s16  ;;  %s17_s13 = int_to_ptr.vmem [resolvable:$true] %s16_s13 }
   0x4   :  { %p890_p1 = scmp.lt.u32.totalorder %s886_s16, %s1076_s0 }
   0x6   :  { %p892_p2 = pnand %p890_p1, %p887_p0 }
   0x8   :  { %895 = shalt.err (!%p892_p2)
}
   0x9   :  { %s896_s21 = scalar_lea.vmem %s17_s13, 2048  ;;  %p901_p4 = scmp.lt.s32.totalorder %s17_s13, %s17_s13 }
   0xa   :  { %p897_p3 = scmp.ne.s32.totalorder %s17_s13, %s896_s21  ;;  %p902_p5 = scmp.lt.s32.totalorder %s896_s21, %s896_s21 }
   0xc   :  { %p903_p6 = por %p902_p5, %p901_p4 }
   0xe   :  { %p904_p7 = pnand %p903_p6, %p897_p3 }
  0x10   :  { %907 = shalt.err (!%p904_p7)
}
  0x11   :  { %s959_s22 = smov 64   ;;  %s960_s23 = smov 4  }
  0x12   :  { %22 = dma.hbm_to_vmem [thread:$0]  %s1076_s0, 2048, %s17_s13, [#allocation3], %s959_s22, %s959_s22, %s960_s23  }
  0x13   :  { %s961_s26 = smov [#allocation5]   ;;  %s908_s30 = scalar_lea.hbm %s1077_s1, 1024 }
  0x14   :  { %s28_s27 = sshll.u32 %s961_s26, 4  ;;  %p909_p8 = scmp.ne.s32.totalorder %s1077_s1, %s908_s30  ;;  %s29_s27 = int_to_ptr.vmem [resolvable:$true] %s28_s27 }
  0x15   :  { %p912_p9 = scmp.lt.u32.totalorder %s908_s30, %s1077_s1 }
  0x17   :  { %p914_p10 = pnand %p912_p9, %p909_p8 }
  0x19   :  { %917 = shalt.err (!%p914_p10)
}
  0x1a   :  { %s918_s8 = scalar_lea.vmem %s29_s27, 1024  ;;  %p923_p12 = scmp.lt.s32.totalorder %s29_s27, %s29_s27 }
  0x1b   :  { %p919_p11 = scmp.ne.s32.totalorder %s29_s27, %s918_s8  ;;  %p924_p13 = scmp.lt.s32.totalorder %s918_s8, %s918_s8 }
  0x1d   :  { %p925_p0 = por %p924_p13, %p923_p12 }
  0x1f   :  { %p926_p1 = pnand %p925_p0, %p919_p11 }
  0x21   :  { %929 = shalt.err (!%p926_p1)
}
  0x22   :  { %34 = dma.hbm_to_vmem [thread:$0]  %s1077_s1, 1024, %s29_s27, [#allocation6], %s959_s22, %s959_s22, %s960_s23  }
  0x23   :  { %952 = dma.done.wait [#allocation3], 2048  }
  0x24   :  { %953 = vsyncadd [#allocation3], 4294965248 }
  0x25   :  { %954 = dma.done.wait [#allocation6], 1024  }
  0x26   :  { %955 = vsyncadd [#allocation6], 4294966272  ;;  %v734_v0 = vld [vmem:[#allocation5] sm:$0xff]   ;;  %v735_v1 = vld [vmem:[#allocation5 + $0x8] sm:$0xff]  }
  0x27   :  { %663 = vmatprep.subr.bf16.mxu0 %v734_v0  ;;  %711 = vmatprep.subr.bf16.mxu1 %v734_v0  ;;  %v736_v2 = vld [vmem:[#allocation5 + $0x10] sm:$0xff]   ;;  %v737_v3 = vld [vmem:[#allocation5 + $0x18] sm:$0xff]   ;;  %v742_v4 = vld [vmem:[#allocation2] sm:$0xff]  }
  0x28   :  { %664 = vmatpush3.bf16.msra.mxu0 %v734_v0  ;;  %719 = vmatpush3.bf16.msra.mxu1 %v734_v0  ;;  %v743_v5 = vld [vmem:[#allocation2 + $0x40] sm:$0xff]   ;;  %v739_v7 = vld [vmem:[#allocation5 + $0x28] sm:$0xff]   ;;  %v740_v8 = vld [vmem:[#allocation5 + $0x30] sm:$0xff]  }
  0x29   :  { %665 = vmatprep.subr.bf16.mxu0 %v735_v1  ;;  %712 = vmatprep.subr.bf16.mxu1 %v735_v1  ;;  %v738_v6 = vld [vmem:[#allocation5 + $0x20] sm:$0xff]   ;;  %v741_v9 = vld [vmem:[#allocation5 + $0x38] sm:$0xff]   ;;  %v744_v10 = vld [vmem:[#allocation2 + $0x8] sm:$0xff]  }
  0x2a   :  { %679 = vmatprep.mubr.bf16.mxu0 %v742_v4  ;;  %695 = vmatprep.mubr.bf16.mxu1 %v743_v5  ;;  %v745_v11 = vld [vmem:[#allocation2 + $0x48] sm:$0xff]   ;;  %v746_v12 = vld [vmem:[#allocation2 + $0x10] sm:$0xff]   ;;  %v748_v14 = vld [vmem:[#allocation2 + $0x18] sm:$0xff]  }
  0x2b   :  { %v747_v13 = vld [vmem:[#allocation2 + $0x50] sm:$0xff]   ;;  %v749_v15 = vld [vmem:[#allocation2 + $0x58] sm:$0xff]   ;;  %v750_v16 = vld [vmem:[#allocation2 + $0x20] sm:$0xff]  }
  0x2c   :  { %666 = vmatpush3.bf16.msra.mxu0 %v735_v1  ;;  %720 = vmatpush3.bf16.msra.mxu1 %v735_v1  ;;  %v751_v17 = vld [vmem:[#allocation2 + $0x60] sm:$0xff]   ;;  %v752_v18 = vld [vmem:[#allocation2 + $0x28] sm:$0xff]   ;;  %v754_v20 = vld [vmem:[#allocation2 + $0x30] sm:$0xff]  }
  0x2d   :  { %667 = vmatprep.subr.bf16.mxu0 %v736_v2  ;;  %713 = vmatprep.subr.bf16.mxu1 %v736_v2  ;;  %v753_v19 = vld [vmem:[#allocation2 + $0x68] sm:$0xff]   ;;  %v755_v21 = vld [vmem:[#allocation2 + $0x70] sm:$0xff]   ;;  %v756_v22 = vld [vmem:[#allocation2 + $0x38] sm:$0xff]  }
  0x2e   :  { %v757_v23 = vld [vmem:[#allocation2 + $0x78] sm:$0xff]   ;;  %v1012_v24 = vld [vmem:[%s1078_s2] ss:$0 sm:$0xff]  ;;  %s962_s2 = smov [#allocation7]  }
  0x2f   :  { %s601_s11 = sshll.u32 %s962_s2, 4  ;;  %s602_s11 = int_to_ptr.vmem [resolvable:$true] %s601_s11 }
  0x30   :  { %668 = vmatpush3.bf16.msra.mxu0 %v736_v2  ;;  %721 = vmatpush3.bf16.msra.mxu1 %v736_v2  ;;  %s930_s12 = scalar_lea.vmem %s602_s11, 4096  ;;  %p935_p3 = scmp.lt.s32.totalorder %s602_s11, %s602_s11 }
  0x31   :  { %669 = vmatprep.subr.bf16.mxu0 %v737_v3  ;;  %714 = vmatprep.subr.bf16.mxu1 %v737_v3  ;;  %p931_p2 = scmp.ne.s32.totalorder %s602_s11, %s930_s12  ;;  %p936_p4 = scmp.lt.s32.totalorder %s930_s12, %s930_s12 }
  0x33   :  { %p937_p5 = por %p936_p4, %p935_p3 }
  0x34   :  { %670 = vmatpush3.bf16.msra.mxu0 %v737_v3  ;;  %722 = vmatpush3.bf16.msra.mxu1 %v737_v3 }
  0x35   :  { %671 = vmatprep.subr.bf16.mxu0 %v738_v6  ;;  %715 = vmatprep.subr.bf16.mxu1 %v738_v6  ;;  %p938_p6 = pnand %p937_p5, %p931_p2 }
  0x38   :  { %672 = vmatpush3.bf16.msra.mxu0 %v738_v6  ;;  %723 = vmatpush3.bf16.msra.mxu1 %v738_v6 }
  0x39   :  { %673 = vmatprep.subr.bf16.mxu0 %v739_v7  ;;  %716 = vmatprep.subr.bf16.mxu1 %v739_v7 }
  0x3c   :  { %674 = vmatpush3.bf16.msra.mxu0 %v739_v7  ;;  %724 = vmatpush3.bf16.msra.mxu1 %v739_v7 }
  0x3d   :  { %675 = vmatprep.subr.bf16.mxu0 %v740_v8  ;;  %717 = vmatprep.subr.bf16.mxu1 %v740_v8 }
  0x40   :  { %676 = vmatpush3.bf16.msra.mxu0 %v740_v8  ;;  %725 = vmatpush3.bf16.msra.mxu1 %v740_v8 }
  0x41   :  { %677 = vmatprep.subr.bf16.mxu0 %v741_v9  ;;  %718 = vmatprep.subr.bf16.mxu1 %v741_v9 }
  0x44   :  { %678 = vmatpush3.bf16.msra.mxu0 %v741_v9  ;;  %726 = vmatpush3.bf16.msra.mxu1 %v741_v9 }
  0x47   :  { %680 = vmatmul.mubr.bf16.vlgmr.msra.gmra.mrb[0].mxu0 %v744_v10  ;;  %696 = vmatmul.mubr.bf16.vlgmr.msra.gmra.mrb[0].mxu1 %v745_v11 }
  0x48   :  { %683 = vmatprep.mubr.bf16.mxu0 %v746_v12  ;;  %699 = vmatprep.mubr.bf16.mxu1 %v747_v13 }
  0x4f   :  { %684 = vmatmul.mubr.bf16.gmra.mrb[4].mxu0 %v748_v14  ;;  %700 = vmatmul.mubr.bf16.gmra.mrb[4].mxu1 %v749_v15 }
  0x50   :  { %687 = vmatprep.mubr.bf16.mxu0 %v750_v16  ;;  %703 = vmatprep.mubr.bf16.mxu1 %v751_v17 }
  0x57   :  { %688 = vmatmul.mubr.bf16.gmra.mrb[8].mxu0 %v752_v18  ;;  %704 = vmatmul.mubr.bf16.gmra.mrb[8].mxu1 %v753_v19 }
  0x58   :  { %691 = vmatprep.mubr.bf16.mxu0 %v754_v20  ;;  %707 = vmatprep.mubr.bf16.mxu1 %v755_v21 }
  0x5f   :  { %692 = vmatmul.mubr.bf16.gmra.mrb[12].mxu0 %v756_v22  ;;  %708 = vmatmul.mubr.bf16.gmra.mrb[12].mxu1 %v757_v23 }
 0x11a   :  { %v681_v25 = vpop.f32.mrb[0].mxu0  ;;  %v697_v26 = vpop.f32.mrb[0].mxu1 }
 0x11b   :  { %v286_v27 = vadd.f32 %v681_v25, %v1012_v24  ;;  %v350_v28 = vadd.f32 %v697_v26, %v1012_v24  ;;  %v277_v29 = vpop.f32.mrb[1].mxu0  ;;  %v341_v30 = vpop.f32.mrb[1].mxu1 }
 0x11c   :  { %v278_v31 = vadd.f32 %v1012_v24, %v277_v29  ;;  %v342_v32 = vadd.f32 %v1012_v24, %v341_v30  ;;  %v682_v33 = vpop.f32.mrb[2].mxu0  ;;  %v698_v34 = vpop.f32.mrb[2].mxu1 }
 0x11d   :  { %v406_v35 = vsub.f32 0.0, %v286_v27  ;;  %v422_v36 = vsub.f32 0.0, %v350_v28  ;;  %v289_v37 = vadd.f32 %v682_v33, %v1012_v24  ;;  %v353_v38 = vadd.f32 %v698_v34, %v1012_v24  ;;  %v280_v39 = vpop.f32.mrb[3].mxu0  ;;  %v344_v40 = vpop.f32.mrb[3].mxu1 }
 0x11e   :  { %v404_v41 = vsub.f32 0.0, %v278_v31  ;;  %v420_v42 = vsub.f32 0.0, %v342_v32  ;;  %v281_v43 = vadd.f32 %v1012_v24, %v280_v39  ;;  %v345_v44 = vadd.f32 %v1012_v24, %v344_v40 }
 0x11f   :  { %v440_v45 = vmul.f32 1.442695, %v406_v35  ;;  %v472_v46 = vmul.f32 1.442695, %v422_v36  ;;  %v407_v47 = vsub.f32 0.0, %v289_v37  ;;  %v423_v48 = vsub.f32 0.0, %v353_v38 }
 0x120   :  { %v436_v49 = vmul.f32 1.442695, %v404_v41  ;;  %v468_v50 = vmul.f32 1.442695, %v420_v42  ;;  %v405_v51 = vsub.f32 0.0, %v281_v43  ;;  %v421_v52 = vsub.f32 0.0, %v345_v44 }
 0x121   :  { %758 = vpow2.f32 %v440_v45  ;;  %v442_v53 = vmul.f32 1.442695, %v407_v47  ;;  %v474_v54 = vmul.f32 1.442695, %v423_v48 }
 0x122   :  { %760 = vpow2.f32 %v472_v46  ;;  %v685_v55 = vpop.f32.mrb[4].mxu0  ;;  %v701_v56 = vpop.f32.mrb[4].mxu1  ;;  %v438_v57 = vmul.f32 1.442695, %v405_v51  ;;  %v470_v62 = vmul.f32 1.442695, %v421_v52 }
 0x123   :  { %762 = vpow2.f32 %v436_v49  ;;  %v302_v58 = vadd.f32 %v685_v55, %v1012_v24  ;;  %v366_v59 = vadd.f32 %v701_v56, %v1012_v24  ;;  %v293_v60 = vpop.f32.mrb[5].mxu0  ;;  %v357_v61 = vpop.f32.mrb[5].mxu1 }
 0x124   :  { %764 = vpow2.f32 %v468_v50  ;;  %v294_v63 = vadd.f32 %v1012_v24, %v293_v60  ;;  %v358_v0 = vadd.f32 %v1012_v24, %v357_v61  ;;  %v686_v1 = vpop.f32.mrb[6].mxu0  ;;  %v702_v2 = vpop.f32.mrb[6].mxu1 }
 0x125   :  { %766 = vpow2.f32 %v442_v53  ;;  %v410_v3 = vsub.f32 0.0, %v302_v58  ;;  %v426_v4 = vsub.f32 0.0, %v366_v59  ;;  %v305_v5 = vadd.f32 %v686_v1, %v1012_v24  ;;  %v296_v6 = vpop.f32.mrb[7].mxu0  ;;  %v360_v7 = vpop.f32.mrb[7].mxu1 }
 0x126   :  { %768 = vpow2.f32 %v474_v54  ;;  %v408_v8 = vsub.f32 0.0, %v294_v63  ;;  %v424_v9 = vsub.f32 0.0, %v358_v0  ;;  %v369_v19 = vadd.f32 %v702_v2, %v1012_v24 }
 0x127   :  { %770 = vpow2.f32 %v438_v57  ;;  %v448_v10 = vmul.f32 1.442695, %v410_v3  ;;  %v480_v11 = vmul.f32 1.442695, %v426_v4  ;;  %v411_v12 = vsub.f32 0.0, %v305_v5 }
 0x128   :  { %772 = vpow2.f32 %v470_v62  ;;  %v444_v13 = vmul.f32 1.442695, %v408_v8  ;;  %v476_v14 = vmul.f32 1.442695, %v424_v9  ;;  %v297_v29 = vadd.f32 %v1012_v24, %v296_v6 }
 0x129   :  { %774 = vpow2.f32 %v448_v10  ;;  %v450_v15 = vmul.f32 1.442695, %v411_v12  ;;  %v427_v36 = vsub.f32 0.0, %v369_v19  ;;  %v361_v39 = vadd.f32 %v1012_v24, %v360_v7 }
 0x12a   :  { %776 = vpow2.f32 %v480_v11  ;;  %v689_v16 = vpop.f32.mrb[8].mxu0  ;;  %v705_v17 = vpop.f32.mrb[8].mxu1  ;;  %v409_v42 = vsub.f32 0.0, %v297_v29 }
 0x12b   :  { %v759_v18 = vpop.eup %758  ;;  %778 = vpow2.f32 %v444_v13  ;;  %v309_v20 = vpop.f32.mrb[9].mxu0  ;;  %v318_v45 = vadd.f32 %v689_v16, %v1012_v24  ;;  %v482_v50 = vmul.f32 1.442695, %v427_v36  ;;  %v382_v51 = vadd.f32 %v705_v17, %v1012_v24 }
 0x12c   :  { %v373_v21 = vpop.f32.mrb[9].mxu1  ;;  %v761_v22 = vpop.eup %760  ;;  %v502_v23 = vadd.f32 1.0, %v759_v18  ;;  %780 = vpow2.f32 %v476_v14  ;;  %v425_v56 = vsub.f32 0.0, %v361_v39  ;;  %v310_v57 = vadd.f32 %v1012_v24, %v309_v20 }
 0x12d   :  { %v690_v25 = vpop.f32.mrb[10].mxu0  ;;  %v706_v26 = vpop.f32.mrb[10].mxu1  ;;  %v518_v28 = vadd.f32 1.0, %v761_v22  ;;  %782 = vpow2.f32 %v450_v15  ;;  %v446_v62 = vmul.f32 1.442695, %v409_v42  ;;  %v374_v63 = vadd.f32 %v1012_v24, %v373_v21 }
 0x12e   :  { %v763_v27 = vpop.eup %762  ;;  %v312_v30 = vpop.f32.mrb[11].mxu0  ;;  %784 = vrcp.f32 %v502_v23  ;;  %v414_v4 = vsub.f32 0.0, %v318_v45  ;;  %v321_v5 = vadd.f32 %v690_v25, %v1012_v24  ;;  %v430_v8 = vsub.f32 0.0, %v382_v51 }
 0x12f   :  { %v765_v31 = vpop.eup %764  ;;  %v500_v32 = vadd.f32 1.0, %v763_v27  ;;  %v376_v33 = vpop.f32.mrb[11].mxu1  ;;  %786 = vrcp.f32 %v518_v28  ;;  %v385_v9 = vadd.f32 %v706_v26, %v1012_v24  ;;  %v412_v12 = vsub.f32 0.0, %v310_v57 }
 0x130   :  { %v767_v34 = vpop.eup %766  ;;  %v516_v35 = vadd.f32 1.0, %v765_v31  ;;  %v313_v13 = vadd.f32 %v1012_v24, %v312_v30  ;;  %v478_v15 = vmul.f32 1.442695, %v425_v56  ;;  %v428_v16 = vsub.f32 0.0, %v374_v63 }
 0x131   :  { %v769_v37 = vpop.eup %768  ;;  %788 = vrcp.f32 %v500_v32  ;;  %v503_v38 = vadd.f32 1.0, %v767_v34  ;;  %v377_v17 = vadd.f32 %v1012_v24, %v376_v33  ;;  %v456_v19 = vmul.f32 1.442695, %v414_v4 }
 0x132   :  { %v771_v40 = vpop.eup %770  ;;  %790 = vrcp.f32 %v516_v35  ;;  %v519_v41 = vadd.f32 1.0, %v769_v37  ;;  %v693_v46 = vpop.f32.mrb[12].mxu0  ;;  %v415_v20 = vsub.f32 0.0, %v321_v5  ;;  %v488_v23 = vmul.f32 1.442695, %v430_v8 }
 0x133   :  { %v773_v43 = vpop.eup %772  ;;  %792 = vrcp.f32 %v503_v38  ;;  %v501_v44 = vadd.f32 1.0, %v771_v40  ;;  %v709_v47 = vpop.f32.mrb[12].mxu1  ;;  %v334_v21 = vadd.f32 %v693_v46, %v1012_v24  ;;  %v431_v25 = vsub.f32 0.0, %v385_v9 }
 0x134   :  { %v775_v48 = vpop.eup %774  ;;  %794 = vrcp.f32 %v519_v41  ;;  %v517_v49 = vadd.f32 1.0, %v773_v43  ;;  %v1032_v52 = vpop.f32.mrb[13].mxu0  ;;  %v398_v26 = vadd.f32 %v709_v47, %v1012_v24  ;;  %v452_v28 = vmul.f32 1.442695, %v412_v12 }
 0x135   :  { %v1034_v53 = vpop.f32.mrb[13].mxu1  ;;  %v777_v54 = vpop.eup %776  ;;  %796 = vrcp.f32 %v501_v44  ;;  %v506_v55 = vadd.f32 1.0, %v775_v48  ;;  %v413_v29 = vsub.f32 0.0, %v313_v13  ;;  %v484_v31 = vmul.f32 1.442695, %v428_v16 }
 0x136   :  { %v1037_v58 = vpop.f32.mrb[14].mxu0  ;;  %v1039_v59 = vpop.f32.mrb[14].mxu1  ;;  %798 = vrcp.f32 %v517_v49  ;;  %v522_v61 = vadd.f32 1.0, %v777_v54  ;;  %v429_v32 = vsub.f32 0.0, %v377_v17  ;;  %v458_v34 = vmul.f32 1.442695, %v415_v20 }
 0x137   :  { %v779_v60 = vpop.eup %778  ;;  %v1042_v0 = vpop.f32.mrb[15].mxu0  ;;  %800 = vrcp.f32 %v506_v55  ;;  %v418_v35 = vsub.f32 0.0, %v334_v21  ;;  %v490_v37 = vmul.f32 1.442695, %v431_v25  ;;  %v434_v38 = vsub.f32 0.0, %v398_v26 }
 0x138   :  { %v1044_v1 = vpop.f32.mrb[15].mxu1  ;;  %v781_v2 = vpop.eup %780  ;;  %v504_v3 = vadd.f32 1.0, %v779_v60  ;;  %802 = vrcp.f32 %v522_v61  ;;  %v454_v40 = vmul.f32 1.442695, %v413_v29  ;;  %v486_v42 = vmul.f32 1.442695, %v429_v32 }
 0x139   :  { %v783_v6 = vpop.eup %782  ;;  %v520_v7 = vadd.f32 1.0, %v781_v2  ;;  %v464_v44 = vmul.f32 1.442695, %v418_v35  ;;  %v496_v46 = vmul.f32 1.442695, %v434_v38  ;;  %v326_v61 = vadd.f32 %v1012_v24, %v1032_v52 }
 0x13a   :  { %v785_v10 = vpop.eup %784  ;;  %804 = vrcp.f32 %v504_v3  ;;  %v507_v11 = vadd.f32 1.0, %v783_v6  ;;  %v390_v2 = vadd.f32 %v1012_v24, %v1034_v53  ;;  %v337_v5 = vadd.f32 %v1037_v58, %v1012_v24 }
 0x13b   :  { %v787_v14 = vpop.eup %786  ;;  %566 = vst [vmem:[#allocation7 + $0x10] sm:$0xff] %v785_v10  ;;  %806 = vrcp.f32 %v520_v7  ;;  %v401_v8 = vadd.f32 %v1039_v59, %v1012_v24  ;;  %v416_v10 = vsub.f32 0.0, %v326_v61  ;;  %v393_v58 = vadd.f32 %v1012_v24, %v1044_v1 }
 0x13c   :  { %v789_v18 = vpop.eup %788  ;;  %582 = vst [vmem:[#allocation7 + $0x90] sm:$0xff] %v787_v14  ;;  %808 = vrcp.f32 %v507_v11  ;;  %v329_v11 = vadd.f32 %v1012_v24, %v1042_v0  ;;  %v432_v13 = vsub.f32 0.0, %v390_v2  ;;  %v419_v16 = vsub.f32 0.0, %v337_v5 }
 0x13d   :  { %v791_v22 = vpop.eup %790  ;;  %564 = vst [vmem:[#allocation7] sm:$0xff] %v789_v18  ;;  %810 = vpow2.f32 %v482_v50  ;;  %v435_v18 = vsub.f32 0.0, %v401_v8  ;;  %v460_v21 = vmul.f32 1.442695, %v416_v10  ;;  %v433_v26 = vsub.f32 0.0, %v393_v58 }
 0x13e   :  { %v793_v27 = vpop.eup %792  ;;  %580 = vst [vmem:[#allocation7 + $0x80] sm:$0xff] %v791_v22  ;;  %812 = vpow2.f32 %v446_v62  ;;  %v417_v0 = vsub.f32 0.0, %v329_v11  ;;  %v492_v25 = vmul.f32 1.442695, %v432_v13  ;;  %v466_v24 = vmul.f32 1.442695, %v419_v16 }
 0x13f   :  { %v795_v30 = vpop.eup %794  ;;  %567 = vst [vmem:[#allocation7 + $0x18] sm:$0xff] %v793_v27  ;;  %814 = vpow2.f32 %v478_v15  ;;  %v494_v32 = vmul.f32 1.442695, %v433_v26 }
 0x140   :  { %v797_v33 = vpop.eup %796  ;;  %583 = vst [vmem:[#allocation7 + $0x98] sm:$0xff] %v795_v30  ;;  %816 = vpow2.f32 %v456_v19  ;;  %v462_v30 = vmul.f32 1.442695, %v417_v0 }
 0x141   :  { %v799_v36 = vpop.eup %798  ;;  %565 = vst [vmem:[#allocation7 + $0x8] sm:$0xff] %v797_v33  ;;  %818 = vpow2.f32 %v488_v23 }
 0x142   :  { %v801_v39 = vpop.eup %800  ;;  %581 = vst [vmem:[#allocation7 + $0x88] sm:$0xff] %v799_v36  ;;  %820 = vpow2.f32 %v452_v28  ;;  %v498_v28 = vmul.f32 1.442695, %v435_v18 }
 0x143   :  { %v803_v41 = vpop.eup %802  ;;  %570 = vst [vmem:[#allocation7 + $0x30] sm:$0xff] %v801_v39  ;;  %822 = vpow2.f32 %v484_v31 }
 0x144   :  { %v805_v43 = vpop.eup %804  ;;  %586 = vst [vmem:[#allocation7 + $0xb0] sm:$0xff] %v803_v41  ;;  %824 = vpow2.f32 %v458_v34 }
 0x145   :  { %v807_v45 = vpop.eup %806  ;;  %568 = vst [vmem:[#allocation7 + $0x20] sm:$0xff] %v805_v43  ;;  %826 = vpow2.f32 %v490_v37 }
 0x146   :  { %v809_v47 = vpop.eup %808  ;;  %584 = vst [vmem:[#allocation7 + $0xa0] sm:$0xff] %v807_v45  ;;  %828 = vpow2.f32 %v454_v40 }
 0x147   :  { %v811_v48 = vpop.eup %810  ;;  %571 = vst [vmem:[#allocation7 + $0x38] sm:$0xff] %v809_v47  ;;  %830 = vpow2.f32 %v486_v42 }
 0x148   :  { %v813_v49 = vpop.eup %812  ;;  %v523_v50 = vadd.f32 1.0, %v811_v48  ;;  %832 = vpow2.f32 %v464_v44 }
 0x149   :  { %v815_v51 = vpop.eup %814  ;;  %v505_v54 = vadd.f32 1.0, %v813_v49  ;;  %834 = vpow2.f32 %v496_v46 }
 0x14a   :  { %v817_v55 = vpop.eup %816  ;;  %836 = vrcp.f32 %v523_v50  ;;  %v521_v56 = vadd.f32 1.0, %v815_v51 }
 0x14b   :  { %v819_v57 = vpop.eup %818  ;;  %838 = vrcp.f32 %v505_v54  ;;  %v510_v60 = vadd.f32 1.0, %v817_v55 }
 0x14c   :  { %v821_v62 = vpop.eup %820  ;;  %840 = vrcp.f32 %v521_v56  ;;  %v526_v63 = vadd.f32 1.0, %v819_v57 }
 0x14d   :  { %v823_v3 = vpop.eup %822  ;;  %842 = vrcp.f32 %v510_v60  ;;  %v508_v4 = vadd.f32 1.0, %v821_v62 }
 0x14e   :  { %v825_v6 = vpop.eup %824  ;;  %844 = vrcp.f32 %v526_v63  ;;  %v524_v7 = vadd.f32 1.0, %v823_v3 }
 0x14f   :  { %v827_v9 = vpop.eup %826  ;;  %846 = vrcp.f32 %v508_v4  ;;  %v511_v52 = vadd.f32 1.0, %v825_v6 }
 0x150   :  { %v829_v53 = vpop.eup %828  ;;  %848 = vrcp.f32 %v524_v7  ;;  %v527_v12 = vadd.f32 1.0, %v827_v9 }
 0x151   :  { %v831_v14 = vpop.eup %830  ;;  %850 = vrcp.f32 %v511_v52  ;;  %v509_v15 = vadd.f32 1.0, %v829_v53 }
 0x152   :  { %v833_v17 = vpop.eup %832  ;;  %852 = vrcp.f32 %v527_v12  ;;  %v525_v59 = vadd.f32 1.0, %v831_v14 }
 0x153   :  { %v835_v19 = vpop.eup %834  ;;  %854 = vrcp.f32 %v509_v15  ;;  %v514_v20 = vadd.f32 1.0, %v833_v17 }
 0x154   :  { %v837_v22 = vpop.eup %836  ;;  %856 = vrcp.f32 %v525_v59  ;;  %v530_v23 = vadd.f32 1.0, %v835_v19 }
 0x155   :  { %v839_v27 = vpop.eup %838  ;;  %587 = vst [vmem:[#allocation7 + $0xb8] sm:$0xff] %v837_v22  ;;  %858 = vrcp.f32 %v514_v20 }
 0x156   :  { %v841_v1 = vpop.eup %840  ;;  %569 = vst [vmem:[#allocation7 + $0x28] sm:$0xff] %v839_v27  ;;  %860 = vrcp.f32 %v530_v23 }
 0x157   :  { %v843_v29 = vpop.eup %842  ;;  %585 = vst [vmem:[#allocation7 + $0xa8] sm:$0xff] %v841_v1  ;;  %862 = vpow2.f32 %v460_v21 }
 0x158   :  { %v845_v31 = vpop.eup %844  ;;  %574 = vst [vmem:[#allocation7 + $0x50] sm:$0xff] %v843_v29  ;;  %864 = vpow2.f32 %v492_v25 }
 0x159   :  { %v847_v33 = vpop.eup %846  ;;  %590 = vst [vmem:[#allocation7 + $0xd0] sm:$0xff] %v845_v31  ;;  %866 = vpow2.f32 %v466_v24 }
 0x15a   :  { %v849_v34 = vpop.eup %848  ;;  %572 = vst [vmem:[#allocation7 + $0x40] sm:$0xff] %v847_v33  ;;  %868 = vpow2.f32 %v498_v28 }
 0x15b   :  { %v851_v35 = vpop.eup %850  ;;  %588 = vst [vmem:[#allocation7 + $0xc0] sm:$0xff] %v849_v34  ;;  %870 = vpow2.f32 %v462_v30 }
 0x15c   :  { %v853_v36 = vpop.eup %852  ;;  %575 = vst [vmem:[#allocation7 + $0x58] sm:$0xff] %v851_v35  ;;  %872 = vpow2.f32 %v494_v32 }
 0x15d   :  { %v855_v37 = vpop.eup %854  ;;  %591 = vst [vmem:[#allocation7 + $0xd8] sm:$0xff] %v853_v36 }
 0x15e   :  { %v857_v38 = vpop.eup %856  ;;  %573 = vst [vmem:[#allocation7 + $0x48] sm:$0xff] %v855_v37 }
 0x15f   :  { %v859_v39 = vpop.eup %858  ;;  %589 = vst [vmem:[#allocation7 + $0xc8] sm:$0xff] %v857_v38 }
 0x160   :  { %v861_v40 = vpop.eup %860  ;;  %578 = vst [vmem:[#allocation7 + $0x70] sm:$0xff] %v859_v39 }
 0x161   :  { %v863_v41 = vpop.eup %862  ;;  %594 = vst [vmem:[#allocation7 + $0xf0] sm:$0xff] %v861_v40 }
 0x162   :  { %v865_v42 = vpop.eup %864  ;;  %v512_v43 = vadd.f32 1.0, %v863_v41 }
 0x163   :  { %v867_v44 = vpop.eup %866  ;;  %v528_v45 = vadd.f32 1.0, %v865_v42 }
 0x164   :  { %v869_v46 = vpop.eup %868  ;;  %874 = vrcp.f32 %v512_v43  ;;  %v515_v47 = vadd.f32 1.0, %v867_v44 }
 0x165   :  { %v871_v48 = vpop.eup %870  ;;  %876 = vrcp.f32 %v528_v45  ;;  %v531_v49 = vadd.f32 1.0, %v869_v46 }
 0x166   :  { %v873_v50 = vpop.eup %872  ;;  %878 = vrcp.f32 %v515_v47  ;;  %v513_v51 = vadd.f32 1.0, %v871_v48 }
 0x167   :  { %880 = vrcp.f32 %v531_v49  ;;  %v529_v54 = vadd.f32 1.0, %v873_v50 }
 0x168   :  { %882 = vrcp.f32 %v513_v51 }
 0x169   :  { %884 = vrcp.f32 %v529_v54 }
 0x16e   :  { %v875_v55 = vpop.eup %874 }
 0x16f   :  { %v877_v56 = vpop.eup %876  ;;  %576 = vst [vmem:[#allocation7 + $0x60] sm:$0xff] %v875_v55 }
 0x170   :  { %v879_v57 = vpop.eup %878  ;;  %592 = vst [vmem:[#allocation7 + $0xe0] sm:$0xff] %v877_v56 }
 0x171   :  { %v881_v60 = vpop.eup %880  ;;  %579 = vst [vmem:[#allocation7 + $0x78] sm:$0xff] %v879_v57 }
 0x172   :  { %v883_v61 = vpop.eup %882  ;;  %595 = vst [vmem:[#allocation7 + $0xf8] sm:$0xff] %v881_v60 }
 0x173   :  { %v885_v62 = vpop.eup %884  ;;  %577 = vst [vmem:[#allocation7 + $0x68] sm:$0xff] %v883_v61 }
 0x174   :  { %593 = vst [vmem:[#allocation7 + $0xe8] sm:$0xff] %v885_v62 }
 0x175   :  { %941 = shalt.err (!%p938_p6)
}
 0x176   :  { %s942_s15 = scalar_lea.hbm %s1079_s3, 4096 }
 0x177   :  { %p943_p7 = scmp.ne.s32.totalorder %s1079_s3, %s942_s15  ;;  %p946_p8 = scmp.lt.u32.totalorder %s942_s15, %s1079_s3 }
 0x179   :  { %p948_p9 = pnand %p946_p8, %p943_p7 }
 0x17b   :  { %951 = shalt.err (!%p948_p9)
}
 0x17c   :  { %s963_s20 = smov 128   ;;  %s964_s21 = smov 8  }
 0x17d   :  { %607 = dma.vmem_to_hbm [thread:$0]  %s602_s11, 4096, %s1079_s3, [#allocation4], %s963_s20, %s963_s20, %s964_s21  }
 0x17e   :  { %956 = dma.done.wait [#allocation4], 4096  }
 0x17f   :  { %957 = vsyncadd [#allocation4], 4294963200 }
 0x180   :  { %611 = vsyncpa [#allocation3], 1 }
 0x181   :  { %612 = vsyncpa [#allocation6], 1 }
 0x182   :  { %613 = vsyncpa [#allocation4], 1 }

</bundles_post_ra>
